<compile_context>
chip_gen: v7x
topology: tpu7x:2x2x1
jax: 0.10.0
libtpu: 0.0.40
codegen_flags: <defaults>
</compile_context>

<pallas_src>
import functools

import jax
import jax.numpy as jnp
from jax.experimental import pallas as pl
from jax.experimental.pallas import tpu as pltpu


def _binary_loss_kernel(d_ref, out_ref, acc_ref):
    j = pl.program_id(1)                      # accumulation ("arbitrary") axis

    @pl.when(j == 0)
    def _init():
        acc_ref[...] = jnp.zeros_like(acc_ref)

    d = d_ref[...].astype(jnp.float32)        # (block_rows, 128)
    # Stable softplus: max(d, 0) + log1p(exp(-|d|)) -> exactly 2 EUP ops/elem.
    sp = jnp.maximum(d, 0.0) + jnp.log1p(jnp.exp(-jnp.abs(d)))
    # Fold the block into a single (8, 128) vreg accumulator (vector adds only;
    # no cross-lane work, no big scratch, one vreg store per step).
    acc_ref[...] += jnp.sum(sp.reshape(-1, 8, sp.shape[-1]), axis=0)

    @pl.when(j == pl.num_programs(1) - 1)
    def _finalize():
        out_ref[0] = acc_ref[...]


def _round_up(x, m):
    return ((x + m - 1) // m) * m


@functools.partial(jax.jit,
                   static_argnames=("max_block_rows", "n_split", "input_dtype"))
def binary_loss(pos_score, neg_score, *, max_block_rows=2048, n_split=2,
                input_dtype=jnp.float32):
    """pos_score: (Np, 2), neg_score: (Nn, 2). Returns scalar f32 loss.

    input_dtype=jnp.bfloat16 halves kernel HBM reads (logits rounded to bf16;
    in-kernel math stays f32).
    """
    assert pos_score.ndim == 2 and neg_score.ndim == 2
    assert pos_score.shape[1] == 2 and neg_score.shape[1] == 2, (
        "BinaryLoss Pallas kernel is specialized to 2 classes")

    lanes = 128
    n = pos_score.shape[0] + neg_score.shape[0]

    # Single fused plane: per-sample margin d = wrong_logit - right_logit.
    d = jnp.concatenate([
        pos_score[:, 0] - pos_score[:, 1],     # positives: target class 1
        neg_score[:, 1] - neg_score[:, 0],     # negatives: target class 0
    ]).astype(input_dtype)

    # Lane-dense tiling: (rows_total, 128), split into n_split "parallel" grid
    # slots (megacore on v7x) x blocks_per_split accumulation steps.
    rows_needed = pl.cdiv(max(n, 1), lanes)
    block_rows = max(8, min(max_block_rows,
                            _round_up(pl.cdiv(rows_needed, n_split), 8)))
    blocks_per_split = pl.cdiv(rows_needed, n_split * block_rows)
    rows_total = n_split * blocks_per_split * block_rows
    pad = rows_total * lanes - n

    # Padding contributes exactly 0: softplus(-1e30) == 0.0 (also in bf16).
    d = jnp.pad(d, (0, pad), constant_values=-1e30).reshape(rows_total, lanes)

    row_block = lambda c, j: (c * blocks_per_split + j, 0)

    # Double-buffered single input + one-vreg accumulator; only bump scoped
    # VMEM when an unusually large block is requested (cap well under v7x's
    # 64 MiB physical VMEM).
    in_bytes = block_rows * lanes * jnp.dtype(input_dtype).itemsize
    vmem_limit = None
    if 2 * in_bytes > 12 * (1 << 20):
        vmem_limit = min(2 * in_bytes + (4 << 20), 32 * (1 << 20))

    out = pl.pallas_call(
        _binary_loss_kernel,
        out_shape=jax.ShapeDtypeStruct((n_split, 8, lanes), jnp.float32),
        grid_spec=pltpu.PrefetchScalarGridSpec(
            num_scalar_prefetch=0,
            grid=(n_split, blocks_per_split),
            in_specs=[pl.BlockSpec((block_rows, lanes), row_block)],
            out_specs=pl.BlockSpec((1, 8, lanes), lambda c, j: (c, 0, 0)),
            scratch_shapes=[pltpu.VMEM((8, lanes), jnp.float32)],
        ),
        compiler_params=pltpu.CompilerParams(
            dimension_semantics=("parallel", "arbitrary"),
            vmem_limit_bytes=vmem_limit),
    )(d)

    # Final tiny reduction (n_split x 8 x 128 partial sums) -> scalar.
    return jnp.sum(out)


def binary_loss_ref(pos_score, neg_score):
    pos_logp = jax.nn.log_softmax(pos_score.astype(jnp.float32), axis=1)
    neg_logp = jax.nn.log_softmax(neg_score.astype(jnp.float32), axis=1)
    return jnp.sum(-pos_logp[:, 1]) + jnp.sum(-neg_logp[:, 0])


if __name__ == "__main__":
    key = jax.random.PRNGKey(0)
    k_pos, k_neg, k2, k3 = jax.random.split(key, 4)

    # Small shapes consistent with the module: (N, 2) class scores.
    Np, Nn, C = 8, 8, 2
    pos_score = jax.random.normal(k_pos, (Np, C), dtype=jnp.float32)
    neg_score = jax.random.normal(k_neg, (Nn, C), dtype=jnp.float32)

    loss = binary_loss(pos_score, neg_score)
    jax.block_until_ready(loss)
    ref = binary_loss_ref(pos_score, neg_score)
    assert jnp.allclose(loss, ref, atol=1e-5, rtol=1e-5), (loss, ref)

    # Uneven sizes + forced multi-step accumulation across the grid
    # (tiny blocks -> blocks_per_split > 1, exercising init/acc/finalize).
    pos2 = jax.random.normal(k2, (1200, 2), dtype=jnp.float32)
    neg2 = jax.random.normal(k3, (1000, 2), dtype=jnp.float32)
    loss2 = binary_loss(pos2, neg2, max_block_rows=8)
    jax.block_until_ready(loss2)
    ref2 = binary_loss_ref(pos2, neg2)
    assert jnp.allclose(loss2, ref2, atol=1e-4, rtol=1e-5), (loss2, ref2)

    # Default (large-block) path + optional bf16 input (halved HBM reads);
    # tolerance loosened for bf16 logit rounding.
    loss3 = binary_loss(pos2, neg2)
    jax.block_until_ready(loss3)
    assert jnp.allclose(loss3, ref2, atol=1e-4, rtol=1e-5), (loss3, ref2)
    loss4 = binary_loss(pos2, neg2, input_dtype=jnp.bfloat16)
    jax.block_until_ready(loss4)
    assert jnp.allclose(loss4, ref2, atol=0.5, rtol=5e-2), (loss4, ref2)

    print("KERNEL_OK")
</pallas_src>

<mosaic_0001>
module attributes {stable_mosaic.version = 11 : i64} {
  func.func @_binary_loss_kernel(%arg0: i32, %arg1: i32, %arg2: memref<8x128xf32, #tpu.memory_space<vmem>>, %arg3: memref<1x8x128xf32, #tpu.memory_space<vmem>>, %arg4: memref<8x128xf32, #tpu.memory_space<vmem>>) attributes {dimension_semantics = [#tpu.dimension_semantics<parallel>, #tpu.dimension_semantics<arbitrary>], iteration_bounds = array<i64: 2, 1>, scalar_prefetch = 0 : i64, scratch_operands = 1 : i64, tpu.core_type = #tpu.core_type<tc>, window_params = [{transform_indices = @transform_0, window_bounds = array<i64: 8, 128>}, {transform_indices = @transform_1, window_bounds = array<i64: 1, 8, 128>}]} {
    %c0_i32 = arith.constant 0 : i32
    %0 = arith.cmpi eq, %arg1, %c0_i32 : i32
    %1 = arith.extui %0 : i1 to i32
    %c0_i32_0 = arith.constant 0 : i32
    %2 = arith.cmpi ne, %1, %c0_i32_0 : i32
    scf.if %2 {
      %cst_10 = arith.constant 0.000000e+00 : f32
      %20 = vector.broadcast %cst_10 : f32 to vector<8x128xf32>
      %c0_11 = arith.constant 0 : index
      %c0_12 = arith.constant 0 : index
      %21 = vector.load %arg4[%c0_11, %c0_12] : memref<8x128xf32, #tpu.memory_space<vmem>>, vector<8x128xf32>
      tpu.vector_store %arg4[%c0_11, %c0_12], %20 {strides = array<i32>} : memref<8x128xf32, #tpu.memory_space<vmem>>, vector<8x128xf32>,
    } else {
    }
    %c0 = arith.constant 0 : index
    %c0_1 = arith.constant 0 : index
    %3 = vector.load %arg2[%c0, %c0_1] : memref<8x128xf32, #tpu.memory_space<vmem>>, vector<8x128xf32>
    %cst = arith.constant 0.000000e+00 : f32
    %4 = vector.broadcast %cst : f32 to vector<8x128xf32>
    %5 = arith.maximumf %3, %4 : vector<8x128xf32>
    %6 = math.absf %3 : vector<8x128xf32>
    %cst_2 = arith.constant 0.000000e+00 : f32
    %7 = vector.broadcast %cst_2 : f32 to vector<8x128xf32>
    %8 = arith.subf %7, %6 : vector<8x128xf32>
    %9 = math.exp %8 : vector<8x128xf32>
    %10 = math.log1p %9 : vector<8x128xf32>
    %11 = arith.addf %5, %10 : vector<8x128xf32>
    %c0_3 = arith.constant 0 : index
    %c0_4 = arith.constant 0 : index
    %12 = vector.load %arg4[%c0_3, %c0_4] : memref<8x128xf32, #tpu.memory_space<vmem>>, vector<8x128xf32>
    %13 = vector.shape_cast %11 : vector<8x128xf32> to vector<1x8x128xf32>
    %cst_5 = arith.constant dense<0.000000e+00> : vector<8x128xf32>
    %14 = vector.multi_reduction <add>, %13, %cst_5 [0] : vector<1x8x128xf32> to vector<8x128xf32>
    %15 = arith.addf %12, %14 : vector<8x128xf32>
    %c0_6 = arith.constant 0 : index
    %c0_7 = arith.constant 0 : index
    %16 = vector.load %arg4[%c0_6, %c0_7] : memref<8x128xf32, #tpu.memory_space<vmem>>, vector<8x128xf32>
    tpu.vector_store %arg4[%c0_6, %c0_7], %15 {strides = array<i32>} : memref<8x128xf32, #tpu.memory_space<vmem>>, vector<8x128xf32>,
    %c0_i32_8 = arith.constant 0 : i32
    %17 = arith.cmpi eq, %arg1, %c0_i32_8 : i32
    %18 = arith.extui %17 : i1 to i32
    %c0_i32_9 = arith.constant 0 : i32
    %19 = arith.cmpi ne, %18, %c0_i32_9 : i32
    scf.if %19 {
      %c0_10 = arith.constant 0 : index
      %c0_11 = arith.constant 0 : index
      %20 = vector.load %arg4[%c0_10, %c0_11] : memref<8x128xf32, #tpu.memory_space<vmem>>, vector<8x128xf32>
      %c0_12 = arith.constant 0 : index
      %c0_13 = arith.constant 0 : index
      %c0_14 = arith.constant 0 : index
      %21 = vector.load %arg3[%c0_12, %c0_13, %c0_14] : memref<1x8x128xf32, #tpu.memory_space<vmem>>, vector<1x8x128xf32>
      %22 = vector.shape_cast %21 : vector<1x8x128xf32> to vector<8x128xf32>
      %23 = vector.shape_cast %20 : vector<8x128xf32> to vector<1x8x128xf32>
      tpu.vector_store %arg3[%c0_12, %c0_13, %c0_14], %23 {strides = array<i32>} : memref<1x8x128xf32, #tpu.memory_space<vmem>>, vector<1x8x128xf32>,
    } else {
    }
    return
  }
  func.func @transform_0(%arg0: i32, %arg1: i32) -> (i32, i32) {
    %c1_i32 = arith.constant 1 : i32
    %0 = arith.muli %arg0, %c1_i32 : i32
    %1 = arith.addi %0, %arg1 : i32
    %c0_i32 = arith.constant 0 : i32
    %c0_i32_0 = arith.constant 0 : i32
    return %1, %c0_i32 : i32, i32
  }
  func.func @transform_1(%arg0: i32, %arg1: i32) -> (i32, i32, i32) {
    %c0_i32 = arith.constant 0 : i32
    %c0_i32_0 = arith.constant 0 : i32
    %c0_i32_1 = arith.constant 0 : i32
    return %arg0, %c0_i32, %c0_i32_0 : i32, i32, i32
  }
}

</mosaic_0001>

<bundles_post_ra>
// kernel: binary_loss.1
= control target key start
LH: loop header
LB: loop body
LE: loop exit
PB: predicated region body
PF: predicated region fallthrough
CT: control target
= control target key end

     0   :  { %s293_s6 = smov 0   ;;  %s295_s7 = smov 0   ;;  %s326_s0 = inlined_call_operand.vmem [shape: f32[16,128], index: 0, kind: input, shape index: {}]   ;;  %s327_s1 = inlined_call_operand.vmem [shape: f32[2,8,128], index: 1, kind: output, shape index: {}]  }
   0x1   :  { %s297_s8 = smov 0  }
   0x2 LB: > { %s23_s9 = sadd.s32 1, %s277_s7  ;;  %p226_p0 = scmp.ge.s32.totalorder %s281_s8, 1  ;;  %s281_s8 = sphi %s297_s8, %s11_s8   ;;  %s277_s7 = sphi %s295_s7, %s329_s7   ;;  %s273_s6 = sphi %s293_s6, %s328_s6  }
   0x3   : > { %p25_p1 = scmp.ge.s32.totalorder %s23_s9, 2  ;;  %p102_p2 = scmp.lt.s32.totalorder %s281_s8, 3 }
   0x5   : > { %s331_s9 = smov (%p25_p1, %s23_s9), 0  ;;  %p103_p3 = pnand %p226_p0, %p102_p2 }
   0x6   : > { %p122_p4 = scmp.lt.s32.totalorder (!%p103_p3), %s273_s6, 1 }
   0x7   : > { %106 = sbr.rel (%p103_p3) target bundleno = 54 (0x36), region = 24 }
   0xe   : > { %s333_s6 = smov (!%p122_p4, %s273_s6), 1 }
   0xf   : > { %s227_s10 = sshll.u32 %s333_s6, 3 }
  0x10   : > { %s125_s13 = scalar_lea.vmem %s326_s0, %s227_s10  ;;  %s130_s16 = scalar_lea.vmem %s327_s1, %s227_s10 }
  0x11   : > { %v136_v0 = vld [vmem:[%s125_s13] sm:$0xff] }
  0x12   : > { %v138_v1 = vand.u32 2147483647, %v136_v0  ;;  %v137_v11 = vmax.f32 %v136_v0, 0.0 }
  0x14   : > { %v139_v2 = vsub.f32 0.0, %v138_v1 }
  0x16   : > { %v140_v3 = vmul.f32 1.442695, %v139_v2 }
  0x18   : > { %255 = vpow2.f32 %v140_v3 }
  0x22   : > { %v256_v4 = vpop.eup %255 }
  0x23   : > { %v142_v5 = vadd.f32 1.0, %v256_v4  ;;  %v145_v6 = vmul.f32 -0.5, %v256_v4  ;;  %v148_v8 = vand.u32 2147483647, %v256_v4 }
  0x25   : > { %257 = vlog2.f32 %v142_v5  ;;  %v146_v7 = vadd.f32 1.0, %v145_v6  ;;  %vm149_vm0 = vcmp.lt.f32.partialorder %v148_v8, 0.0004427343 }
  0x27   : > { %v147_v9 = vmul.f32 %v256_v4, %v146_v7 }
  0x2f   : > { %v258_v10 = vpop.eup %257 }
  0x30   : > { %v144_v12 = vmul.f32 0.6931472, %v258_v10 }
  0x32   : > { %v150_v13 = vsel %vm149_vm0, %v147_v9, %v144_v12 }
  0x33   : > { %v151_v14 = vadd.f32 %v150_v13, %v137_v11 }
  0x35   : > { %160 = vst [vmem:[%s130_s16] sm:$0xff] %v151_v14 }
  0x36 PF: > { %s11_s8 = sadd.s32 1, %s281_s8   ;;  %s328_s6 = smov %s277_s7 }
  0x37   : > { %p8_p5 = scmp.ge.s32.totalorder %s11_s8, 4   ;;  %s329_s7 = smov %s331_s9 }
  0x39   :  { %10 = sbr.rel (!%p8_p5) target bundleno = 2 (0x2), region = 62 }

</bundles_post_ra>
